<compile_context>
chip_gen: v7x
topology: tpu7x:2x2x1
jax: 0.10.0
libtpu: 0.0.40
codegen_flags: <defaults>
</compile_context>

<pallas_src>
import math
import functools

import jax
import jax.numpy as jnp
from jax.experimental import pallas as pl
from jax.experimental.pallas import tpu as pltpu


_SQRT_2_OVER_PI = math.sqrt(2.0 / math.pi)
_INV_SQRT_2 = 1.0 / math.sqrt(2.0)
_LANES = 128
_TARGET_TILE_BYTES = 2 << 20      # ~2 MiB per buffer (in the native dtype)
_ROW_ALIGN = 32                   # legal sublane multiple for f32 / bf16 / int8


# --------------------------------- kernels ------------------------------------

def _gelu_tanh_kernel(x_ref, o_ref):
    # GELU(approximate=True): x * 0.5 * (1 + tanh(sqrt(2/pi) * (x + 0.044715 x^3)))
    # Elementwise math in f32 (v5e VPU/EUP have no bf16); I/O in native dtype.
    x = x_ref[...].astype(jnp.float32)
    inner = _SQRT_2_OVER_PI * (x + 0.044715 * (x * x * x))
    cdf = 0.5 * (1.0 + jnp.tanh(inner))
    o_ref[...] = (x * cdf).astype(o_ref.dtype)


def _gelu_exact_kernel(x_ref, o_ref):
    # GELU(approximate=False): x * (erf(x / sqrt(2)) + 1) / 2
    # TODO(synk): relies on lax.erf having a Mosaic lowering; unexercised here
    # (the module/demo default is approximate=True).
    x = x_ref[...].astype(jnp.float32)
    o_ref[...] = (x * (jax.lax.erf(x * _INV_SQRT_2) + 1.0) * 0.5).astype(o_ref.dtype)


# ------------------------------- pallas wrapper --------------------------------

def _round_up(v, m):
    return ((v + m - 1) // m) * m


def _choose_tiling(rows, itemsize):
    """Pick (tile_rows, grid_rows).

    ~2 MiB per buffer (keeps 4 live double-buffered tiles <= 8 MiB, under v5e's
    16 MiB scoped-VMEM default), tile_rows a multiple of 32, and an even grid
    (when > 1) so v7x's two TensorCores split the 'parallel' axis evenly.
    """
    target_rows = max(_ROW_ALIGN, _TARGET_TILE_BYTES // (_LANES * itemsize))
    if rows <= target_rows:
        return rows, 1                                  # single full-array block
    tile_rows = (target_rows // _ROW_ALIGN) * _ROW_ALIGN
    grid_rows = pl.cdiv(rows, tile_rows)
    if grid_rows > 1 and grid_rows % 2:                 # balance across v7x cores
        grid_rows += 1
        tile_rows = _round_up(pl.cdiv(rows, grid_rows), _ROW_ALIGN)
        grid_rows = pl.cdiv(rows, tile_rows)
    return tile_rows, grid_rows


def pallas_gelu(x, approximate=True):
    assert jnp.issubdtype(x.dtype, jnp.floating), "GELU expects a floating dtype"
    orig_shape = x.shape
    dtype = x.dtype
    n = x.size

    # Lane-dense (rows, 128) slab in the native dtype (no extra HBM cast pass).
    flat = x.reshape(-1)
    pad = (-n) % _LANES
    if pad:                         # rare path: only when n is not a lane multiple
        flat = jnp.pad(flat, (0, pad))
    rows = flat.shape[0] // _LANES
    x2d = flat.reshape(rows, _LANES)

    tile_rows, grid_rows = _choose_tiling(rows, x2d.dtype.itemsize)
    kernel = _gelu_tanh_kernel if approximate else _gelu_exact_kernel

    out2d = pl.pallas_call(
        kernel,
        out_shape=jax.ShapeDtypeStruct((rows, _LANES), dtype),
        grid=(grid_rows,),
        in_specs=[pl.BlockSpec((tile_rows, _LANES), lambda i: (i, 0))],
        out_specs=pl.BlockSpec((tile_rows, _LANES), lambda i: (i, 0)),
        compiler_params=pltpu.CompilerParams(
            dimension_semantics=("parallel",)),
    )(x2d)

    out = out2d.reshape(-1)
    if pad:
        out = out[:n]
    return out.reshape(orig_shape)


# ------------------------------------ main --------------------------------------

if __name__ == "__main__":
    key = jax.random.PRNGKey(0)
    x = jax.random.normal(key, (2, 4, 16, 16), jnp.float32)

    fwd = jax.jit(functools.partial(pallas_gelu, approximate=True))
    y = fwd(x)
    jax.block_until_ready(y)

    # correctness vs the same tanh-approximate formula
    ref = jax.nn.gelu(x, approximate=True)
    assert y.shape == x.shape and y.dtype == x.dtype
    assert jnp.max(jnp.abs(y - ref)) < 1e-5

    # native-dtype (bf16) path: I/O stays bf16, math in f32 inside the kernel
    xb = x.astype(jnp.bfloat16)
    yb = fwd(xb)
    jax.block_until_ready(yb)
    assert yb.dtype == jnp.bfloat16
    assert jnp.max(jnp.abs(yb.astype(jnp.float32) - ref)) < 3e-2

    print("KERNEL_OK")
</pallas_src>

<mosaic_0001>
module attributes {stable_mosaic.version = 11 : i64} {
  func.func @_gelu_tanh_kernel(%arg0: i32, %arg1: memref<16x128xf32, #tpu.memory_space<vmem>>, %arg2: memref<16x128xf32, #tpu.memory_space<vmem>>) attributes {dimension_semantics = [#tpu.dimension_semantics<parallel>], iteration_bounds = array<i64: 1>, scalar_prefetch = 0 : i64, scratch_operands = 0 : i64, tpu.core_type = #tpu.core_type<tc>, window_params = [{transform_indices = @transform_0, window_bounds = array<i64: 16, 128>}, {transform_indices = @transform_1, window_bounds = array<i64: 16, 128>}]} {
    %c0 = arith.constant 0 : index
    %c0_0 = arith.constant 0 : index
    %0 = vector.load %arg1[%c0, %c0_0] : memref<16x128xf32, #tpu.memory_space<vmem>>, vector<16x128xf32>
    %1 = arith.mulf %0, %0 : vector<16x128xf32>
    %2 = arith.mulf %1, %0 : vector<16x128xf32>
    %cst = arith.constant 4.471500e-02 : f32
    %3 = vector.broadcast %cst : f32 to vector<16x128xf32>
    %4 = arith.mulf %3, %2 : vector<16x128xf32>
    %5 = arith.addf %0, %4 : vector<16x128xf32>
    %cst_1 = arith.constant 0.797884583 : f32
    %6 = vector.broadcast %cst_1 : f32 to vector<16x128xf32>
    %7 = arith.mulf %6, %5 : vector<16x128xf32>
    %8 = math.tanh %7 : vector<16x128xf32>
    %cst_2 = arith.constant 1.000000e+00 : f32
    %9 = vector.broadcast %cst_2 : f32 to vector<16x128xf32>
    %10 = arith.addf %9, %8 : vector<16x128xf32>
    %cst_3 = arith.constant 5.000000e-01 : f32
    %11 = vector.broadcast %cst_3 : f32 to vector<16x128xf32>
    %12 = arith.mulf %11, %10 : vector<16x128xf32>
    %13 = arith.mulf %0, %12 : vector<16x128xf32>
    %c0_4 = arith.constant 0 : index
    %c0_5 = arith.constant 0 : index
    %14 = vector.load %arg2[%c0_4, %c0_5] : memref<16x128xf32, #tpu.memory_space<vmem>>, vector<16x128xf32>
    tpu.vector_store %arg2[%c0_4, %c0_5], %13 {strides = array<i32>} : memref<16x128xf32, #tpu.memory_space<vmem>>, vector<16x128xf32>,
    return
  }
  func.func @transform_0(%arg0: i32) -> (i32, i32) {
    %c0_i32 = arith.constant 0 : i32
    %c0_i32_0 = arith.constant 0 : i32
    return %arg0, %c0_i32 : i32, i32
  }
  func.func @transform_1(%arg0: i32) -> (i32, i32) {
    %c0_i32 = arith.constant 0 : i32
    %c0_i32_0 = arith.constant 0 : i32
    return %arg0, %c0_i32 : i32, i32
  }
}

</mosaic_0001>

<bundles_post_ra>
// kernel: pallas_gelu.1
= control target key start
LH: loop header
LB: loop body
LE: loop exit
PB: predicated region body
PF: predicated region fallthrough
CT: control target
= control target key end

     0   :  { %s60_s0 = inlined_call_operand.vmem [shape: f32[16,128], index: 0, kind: input, shape index: {}]   ;;  %s61_s1 = inlined_call_operand.vmem [shape: f32[16,128], index: 1, kind: output, shape index: {}]  }
   0x1   :  { %v8_v0 = vld [vmem:[%s60_s0] sm:$0xff]  ;;  %v9_v1 = vld [vmem:[%s60_s0 + $0x8] sm:$0xff] }
   0x2   :  { %v10_v2 = vmul.f32 %v8_v0, %v8_v0  ;;  %v11_v3 = vmul.f32 %v9_v1, %v9_v1 }
   0x4   :  { %v12_v4 = vmul.f32 %v10_v2, %v8_v0  ;;  %v13_v5 = vmul.f32 %v11_v3, %v9_v1 }
   0x6   :  { %v14_v6 = vmul.f32 0.044715, %v12_v4  ;;  %v15_v7 = vmul.f32 0.044715, %v13_v5 }
   0x8   :  { %v16_v8 = vadd.f32 %v14_v6, %v8_v0  ;;  %v17_v9 = vadd.f32 %v15_v7, %v9_v1 }
   0xa   :  { %v18_v10 = vmul.f32 0.7978846, %v16_v8  ;;  %v19_v11 = vmul.f32 0.7978846, %v17_v9 }
   0xc   :  { %34 = vtanh.f32 %v18_v10 }
   0xd   :  { %36 = vtanh.f32 %v19_v11 }
  0x16   :  { %v35_v12 = vpop.eup %34 }
  0x17   :  { %v37_v13 = vpop.eup %36  ;;  %v22_v14 = vadd.f32 1.0, %v35_v12 }
  0x18   :  { %v23_v15 = vadd.f32 1.0, %v37_v13 }
  0x19   :  { %v24_v16 = vmul.f32 0.5, %v22_v14 }
  0x1a   :  { %v25_v17 = vmul.f32 0.5, %v23_v15 }
  0x1b   :  { %v26_v18 = vmul.f32 %v24_v16, %v8_v0 }
  0x1c   :  { %v27_v19 = vmul.f32 %v25_v17, %v9_v1 }
  0x1d   :  { %28 = vst [vmem:[%s61_s1] sm:$0xff] %v26_v18 }
  0x1e   :  { %29 = vst [vmem:[%s61_s1 + $0x8] sm:$0xff] %v27_v19 }

</bundles_post_ra>
